<compile_context>
chip_gen: v7x
topology: tpu7x:2x2x1
jax: 0.10.0
libtpu: 0.0.40
codegen_flags: <defaults>
</compile_context>

<pallas_src>
import math

import jax
import jax.numpy as jnp
from jax.experimental import pallas as pl
from jax.experimental.pallas import tpu as pltpu

HIDDEN = 32  # HIDEN_NEURONS_PER_LAYER in the PyTorch spec


def _round_up(v, m):
    return ((v + m - 1) // m) * m


def _silu(h):
    # SiLU(h) = h * sigmoid(h) = h / (1 + exp(-h)); exp + approx-reciprocal both
    # run on the EUP slot.  exp(-h) -> inf for very negative h gives 1/inf -> 0,
    # matching the SiLU limit, so this is numerically safe.
    return h * pl.reciprocal(1.0 + jnp.exp(-h), approx=True)


def _encoder_kernel(x_ref, w1_ref, b1_ref, w2_ref, b2_ref, w3_ref, b3_ref, o_ref):
    """Fused 3-layer MLP on one batch tile.

    x is cast to the MXU compute dtype in-kernel; accumulation, bias adds and
    SiLU run in f32.
    """
    cd = w1_ref.dtype  # MXU compute dtype (bf16 by default, or f32)

    x = x_ref[...].astype(cd)  # in-kernel cast: no separate HBM pre-pass

    # Layer 1: Linear + SiLU
    h = jnp.dot(x, w1_ref[...], preferred_element_type=jnp.float32)
    h = _silu(h + b1_ref[...])          # b1 (1, HIDDEN) broadcasts over batch

    # Layer 2: Linear + SiLU
    h = jnp.dot(h.astype(cd), w2_ref[...], preferred_element_type=jnp.float32)
    h = _silu(h + b2_ref[...])

    # Layer 3: Linear (no activation)
    h = jnp.dot(h.astype(cd), w3_ref[...], preferred_element_type=jnp.float32)
    o_ref[...] = (h + b3_ref[...]).astype(o_ref.dtype)


def _pick_block_b(input_dim, latent_dim, compute_bytes, vmem_budget_bytes):
    """Largest batch tile (multiple of 16) whose VMEM footprint fits the budget.

    Lane-padding-aware: every array whose last dim is < 128 still occupies 128
    lanes per row in VMEM/vregs.  Counts the double-buffered x/out tiles, the
    in-kernel bf16 copy of x, and the f32 h1/h2/h3 intermediates (+ their cast
    copies).  Capped to [16, 8192]."""
    in_pad = _round_up(input_dim, 128)
    out_pad = _round_up(latent_dim, 128)
    hid_pad = _round_up(HIDDEN, 128)
    per_row = (
        2 * in_pad * 4                      # x f32 tile, double-buffered
        + in_pad * compute_bytes            # in-kernel cast copy of x
        + 2 * out_pad * 4                   # output tile, double-buffered
        + 2 * hid_pad * (4 + compute_bytes)  # h1/h2 in f32 + cast copies
        + out_pad * 4                       # h3 (f32) before the store cast
    )
    tb = int(vmem_budget_bytes // max(per_row, 1))
    return max(16, min(8192, (tb // 16) * 16))


def encoder_forward(x, params, *, compute_dtype=jnp.bfloat16, block_b=None,
                    out_dtype=None, vmem_limit_bytes=32 * 1024 * 1024):
    """x: [B, input_dim]. params: weights stored transposed ([in, out]) + biases."""
    w1, b1, w2, b2, w3, b3 = (params["w1"], params["b1"], params["w2"],
                              params["b2"], params["w3"], params["b3"])
    B, input_dim = x.shape
    latent_dim = w3.shape[1]
    out_dtype = x.dtype if out_dtype is None else out_dtype

    # MXU operands in compute_dtype; biases in f32 (added post-matmul).
    w1c, w2c, w3c = (w.astype(compute_dtype) for w in (w1, w2, w3))
    b1f, b2f, b3f = (b.astype(jnp.float32).reshape(1, -1) for b in (b1, b2, b3))

    compute_bytes = jnp.dtype(compute_dtype).itemsize
    if block_b is None:
        # Budget against half of the scoped VMEM limit: leaves headroom for the
        # resident weights/biases and compiler scratch (safe on v7x's 64 MiB).
        block_b = _pick_block_b(input_dim, latent_dim, compute_bytes,
                                vmem_budget_bytes=vmem_limit_bytes // 2)
    tb = max(16, (int(block_b) // 16) * 16)     # multiple of 16 (sublane packing)
    tb = min(tb, _round_up(B, 16))              # don't over-pad tiny batches
    if B > 16:
        # Guarantee >= 2 grid steps so the "parallel" batch axis can shard
        # across both TensorCores on v7x; negligible extra per-step cost on
        # single-TC v5e/v6e.
        tb = min(tb, _round_up((B + 1) // 2, 16))

    grid = (pl.cdiv(B, tb),)   # ragged tail handled by Pallas partial blocks

    def resident(a):  # whole (2-D) array as one block, same block every step
        return pl.BlockSpec(a.shape, lambda i: (0, 0))

    weight_bytes = sum(int(a.size) * a.dtype.itemsize
                       for a in (w1c, b1f, w2c, b2f, w3c, b3f))
    cost = pl.CostEstimate(
        flops=2 * B * (input_dim * HIDDEN + HIDDEN * HIDDEN + HIDDEN * latent_dim),
        transcendentals=2 * HIDDEN * B,     # two 32-wide exp per row
        bytes_accessed=(B * input_dim * x.dtype.itemsize
                        + B * latent_dim * jnp.dtype(out_dtype).itemsize
                        + weight_bytes),
    )

    out = pl.pallas_call(
        _encoder_kernel,
        out_shape=jax.ShapeDtypeStruct((B, latent_dim), out_dtype),
        grid=grid,
        in_specs=[
            pl.BlockSpec((tb, input_dim), lambda i: (i, 0)),   # x: batch-tiled
            resident(w1c), resident(b1f),
            resident(w2c), resident(b2f),
            resident(w3c), resident(b3f),
        ],
        out_specs=pl.BlockSpec((tb, latent_dim), lambda i: (i, 0)),
        compiler_params=pltpu.CompilerParams(
            dimension_semantics=("parallel",),   # megacore sharding on v7x
            vmem_limit_bytes=vmem_limit_bytes,
        ),
        cost_estimate=cost,
    )(x, w1c, b1f, w2c, b2f, w3c, b3f)

    return out


def encoder_reference(x, params, compute_dtype=jnp.float32):
    """Pure-JAX reference with the same cast points as the kernel."""
    cd = compute_dtype
    w1, w2, w3 = (params[k].astype(cd) for k in ("w1", "w2", "w3"))
    b1, b2, b3 = (params[k].astype(jnp.float32).reshape(1, -1)
                  for k in ("b1", "b2", "b3"))
    h = jnp.dot(x.astype(cd), w1, preferred_element_type=jnp.float32) + b1
    h = jax.nn.silu(h)
    h = jnp.dot(h.astype(cd), w2, preferred_element_type=jnp.float32) + b2
    h = jax.nn.silu(h)
    return jnp.dot(h.astype(cd), w3, preferred_element_type=jnp.float32) + b3


def init_encoder_params(key, input_dim, latent_dim, dtype=jnp.float32):
    """PyTorch nn.Linear-style init: U(-1/sqrt(fan_in), 1/sqrt(fan_in)).
    Weights stored transposed ([in, out]) so the kernel computes x @ W."""
    ks = jax.random.split(key, 6)

    def linear(kw, kb, fan_in, fan_out):
        bound = 1.0 / math.sqrt(fan_in)
        w = jax.random.uniform(kw, (fan_in, fan_out), dtype, -bound, bound)
        b = jax.random.uniform(kb, (1, fan_out), dtype, -bound, bound)
        return w, b

    w1, b1 = linear(ks[0], ks[1], input_dim, HIDDEN)
    w2, b2 = linear(ks[2], ks[3], HIDDEN, HIDDEN)
    w3, b3 = linear(ks[4], ks[5], HIDDEN, latent_dim)
    return {"w1": w1, "b1": b1, "w2": w2, "b2": b2, "w3": w3, "b3": b3}


if __name__ == "__main__":
    key = jax.random.PRNGKey(0)
    k_x, k_p = jax.random.split(key)

    batch, input_dim, latent_dim = 64, 16, 8
    x = jax.random.normal(k_x, (batch, input_dim), dtype=jnp.float32)
    params = init_encoder_params(k_p, input_dim, latent_dim)

    # Default path: f32 x fed directly (cast to bf16 in-kernel), f32
    # accumulate/bias/SiLU, auto tile size, 2-step grid (B=64 -> tb=32).
    out_bf16 = jax.block_until_ready(encoder_forward(x, params))
    ref_bf16 = encoder_reference(x, params, compute_dtype=jnp.bfloat16)
    assert out_bf16.shape == (batch, latent_dim)
    assert jnp.allclose(out_bf16, ref_bf16, atol=2e-3, rtol=2e-3), \
        float(jnp.max(jnp.abs(out_bf16 - ref_bf16)))

    # f32 compute path with a small explicit tile: exercises a multi-step grid
    # with a ragged final block (B=20 is not a multiple of the 16-row tile).
    x2 = x[:20]
    out_f32 = jax.block_until_ready(
        encoder_forward(x2, params, compute_dtype=jnp.float32, block_b=16))
    ref_f32 = encoder_reference(x2, params, compute_dtype=jnp.float32)
    assert out_f32.shape == (20, latent_dim)
    # Tolerance covers the approx-reciprocal SiLU (EUP vrcp) vs exact sigmoid.
    assert jnp.allclose(out_f32, ref_f32, atol=2e-3, rtol=2e-3), \
        float(jnp.max(jnp.abs(out_f32 - ref_f32)))

    print("KERNEL_OK")
</pallas_src>

<mosaic_0001>
module attributes {stable_mosaic.version = 11 : i64} {
  func.func @_encoder_kernel(%arg0: i32, %arg1: memref<32x16xf32, #tpu.memory_space<vmem>>, %arg2: memref<16x32xbf16, #tpu.memory_space<vmem>>, %arg3: memref<1x32xf32, #tpu.memory_space<vmem>>, %arg4: memref<32x32xbf16, #tpu.memory_space<vmem>>, %arg5: memref<1x32xf32, #tpu.memory_space<vmem>>, %arg6: memref<32x8xbf16, #tpu.memory_space<vmem>>, %arg7: memref<1x8xf32, #tpu.memory_space<vmem>>, %arg8: memref<32x8xf32, #tpu.memory_space<vmem>>) attributes {dimension_semantics = [#tpu.dimension_semantics<parallel>], iteration_bounds = array<i64: 2>, scalar_prefetch = 0 : i64, scratch_operands = 0 : i64, tpu.core_type = #tpu.core_type<tc>, window_params = [{transform_indices = @transform_0, window_bounds = array<i64: 32, 16>}, {pipeline_mode = #tpu.pipeline_mode<synchronous>, transform_indices = @transform_1, window_bounds = array<i64: 16, 32>}, {pipeline_mode = #tpu.pipeline_mode<synchronous>, transform_indices = @transform_2, window_bounds = array<i64: 1, 32>}, {pipeline_mode = #tpu.pipeline_mode<synchronous>, transform_indices = @transform_3, window_bounds = array<i64: 32, 32>}, {pipeline_mode = #tpu.pipeline_mode<synchronous>, transform_indices = @transform_4, window_bounds = array<i64: 1, 32>}, {pipeline_mode = #tpu.pipeline_mode<synchronous>, transform_indices = @transform_5, window_bounds = array<i64: 32, 8>}, {pipeline_mode = #tpu.pipeline_mode<synchronous>, transform_indices = @transform_6, window_bounds = array<i64: 1, 8>}, {transform_indices = @transform_7, window_bounds = array<i64: 32, 8>}]} {
    %c0 = arith.constant 0 : index
    %c0_0 = arith.constant 0 : index
    %0 = vector.load %arg1[%c0, %c0_0] : memref<32x16xf32, #tpu.memory_space<vmem>>, vector<32x16xf32>
    %1 = arith.truncf %0 : vector<32x16xf32> to vector<32x16xbf16>
    %c0_1 = arith.constant 0 : index
    %c0_2 = arith.constant 0 : index
    %2 = vector.load %arg2[%c0_1, %c0_2] : memref<16x32xbf16, #tpu.memory_space<vmem>>, vector<16x32xbf16>
    %cst = arith.constant dense<0.000000e+00> : vector<32x32xf32>
    %3 = tpu.matmul %1, %2, %cst {dimension_numbers = #tpu.dot_dimension_numbers<[1], [0], [0], [1], [0, 0, 1, 1], [], []>} : vector<32x16xbf16>, vector<16x32xbf16>, vector<32x32xf32> -> vector<32x32xf32>
    %c0_3 = arith.constant 0 : index
    %c0_4 = arith.constant 0 : index
    %4 = vector.load %arg3[%c0_3, %c0_4] : memref<1x32xf32, #tpu.memory_space<vmem>>, vector<1x32xf32>
    %5 = vector.broadcast %4 : vector<1x32xf32> to vector<32x32xf32>
    %6 = arith.addf %3, %5 : vector<32x32xf32>
    %cst_5 = arith.constant 0.000000e+00 : f32
    %7 = vector.broadcast %cst_5 : f32 to vector<32x32xf32>
    %8 = arith.subf %7, %6 : vector<32x32xf32>
    %9 = math.exp %8 : vector<32x32xf32>
    %cst_6 = arith.constant 1.000000e+00 : f32
    %10 = vector.broadcast %cst_6 : f32 to vector<32x32xf32>
    %11 = arith.addf %10, %9 : vector<32x32xf32>
    %12 = tpu.reciprocal %11 {approx = true} : vector<32x32xf32> -> vector<32x32xf32>
    %13 = arith.mulf %6, %12 : vector<32x32xf32>
    %14 = arith.truncf %13 : vector<32x32xf32> to vector<32x32xbf16>
    %c0_7 = arith.constant 0 : index
    %c0_8 = arith.constant 0 : index
    %15 = vector.load %arg4[%c0_7, %c0_8] : memref<32x32xbf16, #tpu.memory_space<vmem>>, vector<32x32xbf16>
    %cst_9 = arith.constant dense<0.000000e+00> : vector<32x32xf32>
    %16 = tpu.matmul %14, %15, %cst_9 {dimension_numbers = #tpu.dot_dimension_numbers<[1], [0], [0], [1], [0, 0, 1, 1], [], []>} : vector<32x32xbf16>, vector<32x32xbf16>, vector<32x32xf32> -> vector<32x32xf32>
    %c0_10 = arith.constant 0 : index
    %c0_11 = arith.constant 0 : index
    %17 = vector.load %arg5[%c0_10, %c0_11] : memref<1x32xf32, #tpu.memory_space<vmem>>, vector<1x32xf32>
    %18 = vector.broadcast %17 : vector<1x32xf32> to vector<32x32xf32>
    %19 = arith.addf %16, %18 : vector<32x32xf32>
    %cst_12 = arith.constant 0.000000e+00 : f32
    %20 = vector.broadcast %cst_12 : f32 to vector<32x32xf32>
    %21 = arith.subf %20, %19 : vector<32x32xf32>
    %22 = math.exp %21 : vector<32x32xf32>
    %cst_13 = arith.constant 1.000000e+00 : f32
    %23 = vector.broadcast %cst_13 : f32 to vector<32x32xf32>
    %24 = arith.addf %23, %22 : vector<32x32xf32>
    %25 = tpu.reciprocal %24 {approx = true} : vector<32x32xf32> -> vector<32x32xf32>
    %26 = arith.mulf %19, %25 : vector<32x32xf32>
    %27 = arith.truncf %26 : vector<32x32xf32> to vector<32x32xbf16>
    %c0_14 = arith.constant 0 : index
    %c0_15 = arith.constant 0 : index
    %28 = vector.load %arg6[%c0_14, %c0_15] : memref<32x8xbf16, #tpu.memory_space<vmem>>, vector<32x8xbf16>
    %cst_16 = arith.constant dense<0.000000e+00> : vector<32x8xf32>
    %29 = tpu.matmul %27, %28, %cst_16 {dimension_numbers = #tpu.dot_dimension_numbers<[1], [0], [0], [1], [0, 0, 1, 1], [], []>} : vector<32x32xbf16>, vector<32x8xbf16>, vector<32x8xf32> -> vector<32x8xf32>
    %c0_17 = arith.constant 0 : index
    %c0_18 = arith.constant 0 : index
    %30 = vector.load %arg7[%c0_17, %c0_18] : memref<1x8xf32, #tpu.memory_space<vmem>>, vector<1x8xf32>
    %31 = vector.broadcast %30 : vector<1x8xf32> to vector<32x8xf32>
    %32 = arith.addf %29, %31 : vector<32x8xf32>
    %c0_19 = arith.constant 0 : index
    %c0_20 = arith.constant 0 : index
    %33 = vector.load %arg8[%c0_19, %c0_20] : memref<32x8xf32, #tpu.memory_space<vmem>>, vector<32x8xf32>
    tpu.vector_store %arg8[%c0_19, %c0_20], %32 {strides = array<i32>} : memref<32x8xf32, #tpu.memory_space<vmem>>, vector<32x8xf32>,
    return
  }
  func.func @transform_0(%arg0: i32) -> (i32, i32) {
    %c0_i32 = arith.constant 0 : i32
    %c0_i32_0 = arith.constant 0 : i32
    return %arg0, %c0_i32 : i32, i32
  }
  func.func @transform_1(%arg0: i32) -> (i32, i32) {
    %c0_i32 = arith.constant 0 : i32
    %c0_i32_0 = arith.constant 0 : i32
    %c0_i32_1 = arith.constant 0 : i32
    return %c0_i32, %c0_i32_0 : i32, i32
  }
  func.func @transform_2(%arg0: i32) -> (i32, i32) {
    %c0_i32 = arith.constant 0 : i32
    %c0_i32_0 = arith.constant 0 : i32
    %c0_i32_1 = arith.constant 0 : i32
    return %c0_i32, %c0_i32_0 : i32, i32
  }
  func.func @transform_3(%arg0: i32) -> (i32, i32) {
    %c0_i32 = arith.constant 0 : i32
    %c0_i32_0 = arith.constant 0 : i32
    %c0_i32_1 = arith.constant 0 : i32
    return %c0_i32, %c0_i32_0 : i32, i32
  }
  func.func @transform_4(%arg0: i32) -> (i32, i32) {
    %c0_i32 = arith.constant 0 : i32
    %c0_i32_0 = arith.constant 0 : i32
    %c0_i32_1 = arith.constant 0 : i32
    return %c0_i32, %c0_i32_0 : i32, i32
  }
  func.func @transform_5(%arg0: i32) -> (i32, i32) {
    %c0_i32 = arith.constant 0 : i32
    %c0_i32_0 = arith.constant 0 : i32
    %c0_i32_1 = arith.constant 0 : i32
    return %c0_i32, %c0_i32_0 : i32, i32
  }
  func.func @transform_6(%arg0: i32) -> (i32, i32) {
    %c0_i32 = arith.constant 0 : i32
    %c0_i32_0 = arith.constant 0 : i32
    %c0_i32_1 = arith.constant 0 : i32
    return %c0_i32, %c0_i32_0 : i32, i32
  }
  func.func @transform_7(%arg0: i32) -> (i32, i32) {
    %c0_i32 = arith.constant 0 : i32
    %c0_i32_0 = arith.constant 0 : i32
    return %arg0, %c0_i32 : i32, i32
  }
}

</mosaic_0001>

<bundles_post_ra>
// kernel: tpu_custom_call.1
= control target key start
LH: loop header
LB: loop body
LE: loop exit
PB: predicated region body
PF: predicated region fallthrough
CT: control target
= control target key end

     0   :  { %s781_s24 = smov 0   ;;  %s833_s0 = inlined_call_operand.vmem [shape: f32[64,16], index: 0, kind: input, shape index: {}]   ;;  %s834_s1 = inlined_call_operand.vmem [shape: bf16[16,32], index: 1, kind: input, shape index: {}]   ;;  %s835_s2 = inlined_call_operand.vmem [shape: f32[1,32], index: 2, kind: input, shape index: {}]   ;;  %s836_s3 = inlined_call_operand.vmem [shape: bf16[32,32], index: 3, kind: input, shape index: {}]   ;;  %s837_s4 = inlined_call_operand.vmem [shape: f32[1,32], index: 4, kind: input, shape index: {}]   ;;  %s838_s5 = inlined_call_operand.vmem [shape: bf16[32,8], index: 5, kind: input, shape index: {}]   ;;  %s839_s6 = inlined_call_operand.vmem [shape: f32[1,8], index: 6, kind: input, shape index: {}]   ;;  %s840_s7 = inlined_call_operand.vmem [shape: f32[64,8], index: 7, kind: output, shape index: {}]  }
   0x1 LB: > { %s630_s25 = sadd.s32 4294967295, %s739_s24   ;;  %p634_p0 = scmp.ge.s32.totalorder %s739_s24, 1  ;;  %s739_s24 = sphi %s781_s24, %s17_s24  }
   0x2   : > { %p238_p1 = scmp.lt.s32.totalorder %s739_s24, 3 }
   0x4   : > { %p239_p2 = pnand %p634_p0, %p238_p1 }
   0x5   : > { %v696_v0 = vld [vmem:[%s834_s1] sm:$0xff] (!%p239_p2)   ;;  %s635_s28 = sshll.u32 (!%p239_p2), %s630_s25, 2  ;;  %vm304_vm0 = vcmask (!%p239_p2), 130048   ;;  %v698_v8 = vld [vmem:[%s836_s3 + $0x8] sm:$0xff] (!%p239_p2)   ;;  %vm409_vm1 = vcmask (!%p239_p2), 261120   ;;  %vm569_vm2 = vcmask (!%p239_p2), 64512  }
   0x6   : > { %242 = sbr.rel (%p239_p2) target bundleno = 738 (0x2e2), region = 48  ;;  %p271_p3 = scmp.lt.s32.totalorder (!%p239_p2), %s635_s28, 7  ;;  %666 = vmatprep.subr.bf16.mxu0 (!%p239_p2), %v696_v0  ;;  %v697_v7 = vld [vmem:[%s836_s3] sm:$0xff] (!%p239_p2)   ;;  %v700_v45 = vld [vmem:[%s838_s5 + $0x8] sm:$0xff] (!%p239_p2)  }
   0x7   : > { %667 = vmatpush3.bf16.msra.mxu0 (!%p239_p2), %v696_v0  ;;  %672 = vmatprep.subr.bf16.mxu1 (!%p239_p2), %v697_v7  ;;  %v639_v9 = vld [vmem:[%s835_s2] ss:$0 sm:$0xff] (!%p239_p2) }
   0x8   : > { %673 = vmatpush3.bf16.msra.mxu1 (!%p239_p2), %v697_v7  ;;  %v699_v44 = vld [vmem:[%s838_s5] sm:$0xff] (!%p239_p2)  }
   0x9   : > { %674 = vmatprep.subr.bf16.mxu1 (!%p239_p2), %v698_v8  ;;  %680 = vmatprep.subr.bf16.mxu0 (!%p239_p2), %v699_v44  ;;  %v643_v46 = vld [vmem:[%s837_s4] ss:$0 sm:$0xff] (!%p239_p2) }
   0xc   : > { %675 = vmatpush3.bf16.msra.mxu1 (!%p239_p2), %v698_v8 }
   0xd   : > { %s842_s28 = smov (!%p271_p3, %s635_s28), 7 }
   0xe   : > { %s636_s29 = sshll.u32 %s842_s28, 3 }
   0xf   : > { %s274_s9 = scalar_lea.vmem %s833_s0, %s636_s29  ;;  %s280_s27 = scalar_lea.vmem %s840_s7, %s636_s29 }
  0x10   : > { %v283_v1 = vld [vmem:[%s274_s9] sm:$0xff]  ;;  %v284_v2 = vld [vmem:[%s274_s9 + $0x8] sm:$0xff]  ;;  %v285_v3 = vld [vmem:[%s274_s9 + $0x10] sm:$0xff] }
  0x11   : > { %v287_v4 = vpack.c.bf16 %v284_v2, %v283_v1  ;;  %v286_v5 = vld [vmem:[%s274_s9 + $0x18] sm:$0xff] }
  0x12   : > { %v288_v6 = vpack.c.bf16 %v286_v5, %v285_v3 }
  0x13   : > { %668 = vmatprep.mubr.msk.bf16.mxu0 %vm304_vm0, %v287_v4 }
  0x14   : > { %669 = vmatmul.mubr.msk.bf16.vlgmr.msra.gmra.mrb[0].mxu0 %vm304_vm0, %v288_v6 }
  0x15   : > { %681 = vmatpush3.bf16.msra.mxu0 %v699_v44 }
  0x16   : > { %682 = vmatprep.subr.bf16.mxu0 %v700_v45 }
  0x19   : > { %683 = vmatpush3.bf16.msra.mxu0 %v700_v45 }
  0xe7   : > { %v670_v10 = vpop.f32.mrb[0].mxu0 }
  0xe8   : > { %v354_v11 = vadd.f32 %v670_v10, %v639_v9  ;;  %v345_v12 = vpop.f32.mrb[1].mxu0 }
  0xe9   : > { %v346_v13 = vadd.f32 %v639_v9, %v345_v12  ;;  %v671_v14 = vpop.f32.mrb[2].mxu0 }
  0xea   : > { %v362_v15 = vsub.f32 0.0, %v354_v11  ;;  %v357_v16 = vadd.f32 %v671_v14, %v639_v9  ;;  %v348_v17 = vpop.f32.mrb[3].mxu0 }
  0xeb   : > { %v360_v18 = vsub.f32 0.0, %v346_v13  ;;  %v349_v19 = vadd.f32 %v639_v9, %v348_v17  ;;  %v648_v17 = vld [vmem:[%s839_s6] ss:$0 sm:$0xff] }
  0xec   : > { %v368_v20 = vmul.f32 1.442695, %v362_v15  ;;  %v363_v21 = vsub.f32 0.0, %v357_v16 }
  0xed   : > { %v364_v22 = vmul.f32 1.442695, %v360_v18  ;;  %v361_v23 = vsub.f32 0.0, %v349_v19 }
  0xee   : > { %701 = vpow2.f32 %v368_v20  ;;  %v370_v24 = vmul.f32 1.442695, %v363_v21 }
  0xef   : > { %703 = vpow2.f32 %v364_v22  ;;  %v366_v25 = vmul.f32 1.442695, %v361_v23 }
  0xf0   : > { %705 = vpow2.f32 %v370_v24 }
  0xf1   : > { %707 = vpow2.f32 %v366_v25 }
  0xf8   : > { %v702_v26 = vpop.eup %701 }
  0xf9   : > { %v704_v27 = vpop.eup %703  ;;  %v374_v28 = vadd.f32 1.0, %v702_v26 }
  0xfa   : > { %v706_v29 = vpop.eup %705  ;;  %v372_v30 = vadd.f32 1.0, %v704_v27 }
  0xfb   : > { %v708_v31 = vpop.eup %707  ;;  %709 = vrcp.f32 %v374_v28  ;;  %v375_v32 = vadd.f32 1.0, %v706_v29 }
  0xfc   : > { %711 = vrcp.f32 %v372_v30  ;;  %v373_v33 = vadd.f32 1.0, %v708_v31 }
  0xfd   : > { %713 = vrcp.f32 %v375_v32 }
  0xfe   : > { %715 = vrcp.f32 %v373_v33 }
 0x105   : > { %v710_v34 = vpop.eup %709 }
 0x106   : > { %v712_v35 = vpop.eup %711  ;;  %v382_v38 = vmul.f32 %v710_v34, %v354_v11 }
 0x107   : > { %v714_v36 = vpop.eup %713  ;;  %v380_v40 = vmul.f32 %v712_v35, %v346_v13 }
 0x108   : > { %v716_v37 = vpop.eup %715  ;;  %v383_v39 = vmul.f32 %v714_v36, %v357_v16 }
 0x109   : > { %v381_v41 = vmul.f32 %v716_v37, %v349_v19 }
 0x10a   : > { %v385_v42 = vpack.c.bf16 %v383_v39, %v382_v38 }
 0x10b   : > { %v384_v43 = vpack.c.bf16 %v381_v41, %v380_v40 }
 0x10d   : > { %676 = vmatprep.mubr.msk.bf16.mxu1 %vm409_vm1, %v384_v43 }
 0x10e   : > { %677 = vmatmul.mubr.msk.bf16.vlgmr.msra.gmra.mrb[0].mxu1 %vm409_vm1, %v385_v42 }
 0x1e1   : > { %v678_v47 = vpop.f32.mrb[0].mxu1 }
 0x1e2   : > { %v459_v48 = vadd.f32 %v678_v47, %v643_v46  ;;  %v450_v49 = vpop.f32.mrb[1].mxu1 }
 0x1e3   : > { %v451_v50 = vadd.f32 %v643_v46, %v450_v49  ;;  %v679_v51 = vpop.f32.mrb[2].mxu1 }
 0x1e4   : > { %v467_v52 = vsub.f32 0.0, %v459_v48  ;;  %v462_v53 = vadd.f32 %v679_v51, %v643_v46  ;;  %v453_v54 = vpop.f32.mrb[3].mxu1 }
 0x1e5   : > { %v465_v55 = vsub.f32 0.0, %v451_v50  ;;  %v454_v56 = vadd.f32 %v643_v46, %v453_v54 }
 0x1e6   : > { %v473_v57 = vmul.f32 1.442695, %v467_v52  ;;  %v468_v58 = vsub.f32 0.0, %v462_v53 }
 0x1e7   : > { %v469_v59 = vmul.f32 1.442695, %v465_v55  ;;  %v466_v60 = vsub.f32 0.0, %v454_v56 }
 0x1e8   : > { %717 = vpow2.f32 %v473_v57  ;;  %v475_v61 = vmul.f32 1.442695, %v468_v58 }
 0x1e9   : > { %719 = vpow2.f32 %v469_v59  ;;  %v471_v62 = vmul.f32 1.442695, %v466_v60 }
 0x1ea   : > { %721 = vpow2.f32 %v475_v61 }
 0x1eb   : > { %723 = vpow2.f32 %v471_v62 }
 0x1f2   : > { %v718_v63 = vpop.eup %717 }
 0x1f3   : > { %v720_v0 = vpop.eup %719  ;;  %v479_v1 = vadd.f32 1.0, %v718_v63 }
 0x1f4   : > { %v722_v2 = vpop.eup %721  ;;  %v477_v3 = vadd.f32 1.0, %v720_v0 }
 0x1f5   : > { %v724_v4 = vpop.eup %723  ;;  %725 = vrcp.f32 %v479_v1  ;;  %v480_v5 = vadd.f32 1.0, %v722_v2 }
 0x1f6   : > { %727 = vrcp.f32 %v477_v3  ;;  %v478_v6 = vadd.f32 1.0, %v724_v4 }
 0x1f7   : > { %729 = vrcp.f32 %v480_v5 }
 0x1f8   : > { %731 = vrcp.f32 %v478_v6 }
 0x1ff   : > { %v726_v7 = vpop.eup %725 }
 0x200   : > { %v728_v8 = vpop.eup %727  ;;  %v487_v11 = vmul.f32 %v726_v7, %v459_v48 }
 0x201   : > { %v730_v9 = vpop.eup %729  ;;  %v485_v13 = vmul.f32 %v728_v8, %v451_v50 }
 0x202   : > { %v732_v10 = vpop.eup %731  ;;  %v488_v12 = vmul.f32 %v730_v9, %v462_v53 }
 0x203   : > { %v486_v14 = vmul.f32 %v732_v10, %v454_v56 }
 0x204   : > { %v490_v15 = vpack.c.bf16 %v488_v12, %v487_v11 }
 0x205   : > { %v489_v16 = vpack.c.bf16 %v486_v14, %v485_v13 }
 0x207   : > { %684 = vmatprep.mubr.msk.bf16.mxu0 %vm409_vm1, %v489_v16 }
 0x208   : > { %685 = vmatmul.mubr.msk.bf16.vlgmr.msra.gmra.mrb[4].mxu0 %vm409_vm1, %v490_v15 }
 0x2db   : > { %v686_v18 = vpop.f32.mrb[4].mxu0 }
 0x2dc   : > { %v554_v19 = vpop.f32.mrb[5].mxu0  ;;  %v563_v24 = vadd.f32 %v686_v18, %v648_v17 }
 0x2dd   : > { %v555_v20 = vadd.f32 %v648_v17, %v554_v19  ;;  %v687_v21 = vpop.f32.mrb[6].mxu0 }
 0x2de   : > { %v557_v22 = vpop.f32.mrb[7].mxu0  ;;  %v566_v25 = vadd.f32 %v687_v21, %v648_v17  ;;  %572 = vst.msk [vmem:[%s280_s27 + $0x10] sm:$0xff] %vm569_vm2, %v563_v24 }
 0x2df   : > { %570 = vst.msk [vmem:[%s280_s27] sm:$0xff] %vm569_vm2, %v555_v20  ;;  %v558_v23 = vadd.f32 %v648_v17, %v557_v22 }
 0x2e0   : > { %573 = vst.msk [vmem:[%s280_s27 + $0x18] sm:$0xff] %vm569_vm2, %v566_v25 }
 0x2e1   : > { %571 = vst.msk [vmem:[%s280_s27 + $0x8] sm:$0xff] %vm569_vm2, %v558_v23 }
 0x2e2 PF: > { %s17_s24 = sadd.s32 1, %s739_s24  }
 0x2e3   : > { %p14_p4 = scmp.ge.s32.totalorder %s17_s24, 4  }
 0x2e5   :  { %16 = sbr.rel (!%p14_p4) target bundleno = 1 (0x1), region = 78 }

</bundles_post_ra>
